<compile_context>
chip_gen: v5e
topology: v5e:2x2
jax: 0.10.0
libtpu: 0.0.40
codegen_flags: <defaults>
</compile_context>

<pallas_src>
import functools

import jax
import jax.numpy as jnp
from jax import lax
from jax.experimental import pallas as pl
from jax.experimental.pallas import tpu as pltpu

LANES = 128
SUBLANES = 8
ACC_ROWS = 64  # (64,128) f32 accumulator tile = 8 independent vreg add chains


def _ssd_kernel(s_ref, t_ref, o_ref, *, ch, n_ch, bpp, blocks, gated, cast, unroll):
    """Accumulate sum((s - t)^2) into a (ch, 128) f32 tile per grid partition."""
    k = pl.program_id(1)

    @pl.when(k == 0)
    def _init():
        o_ref[...] = jnp.zeros_like(o_ref)

    def _accumulate():
        def body(i, acc):
            off = pl.multiple_of(i * ch, ch)
            s = s_ref[pl.ds(off, ch), :]
            t = t_ref[pl.ds(off, ch), :]
            if cast:
                s = s.astype(jnp.float32)
                t = t.astype(jnp.float32)
            d = s - t
            return acc + d * d

        # Register-resident multi-accumulator; chunked slicing bounds VMEM temps.
        acc = lax.fori_loop(0, n_ch, body,
                            jnp.zeros((ch, LANES), jnp.float32),
                            unroll=unroll)
        o_ref[...] += acc

    if gated:
        # Odd block count split 2-way: the phantom step (clamped to the last valid
        # block by the index_map, so no OOB DMA) contributes nothing.
        p = pl.program_id(0)
        pl.when(p * bpp + k < blocks)(_accumulate)
    else:
        _accumulate()


def hint_loss(fm_s, fm_t, *, tile_rows=None):
    """Pallas implementation of the FitNet hint loss: mean((fm_s - fm_t)**2)."""
    assert fm_s.shape == fm_t.shape, "shape mismatch"
    n = int(fm_s.size)
    if n == 0:
        return jnp.float32(0.0)

    s_flat = fm_s.reshape(-1)
    t_flat = fm_t.reshape(-1)

    itemsize = max(jnp.dtype(fm_s.dtype).itemsize, jnp.dtype(fm_t.dtype).itemsize)
    cast = (fm_s.dtype != jnp.float32) or (fm_t.dtype != jnp.float32)

    rows_all = n // LANES                       # full 128-lane rows
    row_unit = max(SUBLANES, 32 // itemsize)    # native sublane tile for the dtype

    # Rows per grid step, dtype-scaled so per-step bytes stay ~4 MiB per input.
    tr = tile_rows if tile_rows is not None else (8192 * 4) // itemsize
    tr = min(tr, rows_all)
    if tr >= ACC_ROWS:
        tr = (tr // ACC_ROWS) * ACC_ROWS
        ch = ACC_ROWS
    else:
        tr = (tr // row_unit) * row_unit
        ch = tr

    if tr == 0:
        # Less than one aligned tile of data: plain XLA handles it.
        d = s_flat.astype(jnp.float32) - t_flat.astype(jnp.float32)
        return jnp.sum(d * d) / n

    blocks = rows_all // tr
    main_rows = blocks * tr
    main_elems = main_rows * LANES

    # Lane-dense 2-D view of the aligned region.  When n % 128 == 0 this is a pure
    # reshape (no HBM copy); the grid simply never touches rows >= main_rows.
    if n % LANES == 0:
        s2d = s_flat.reshape(rows_all, LANES)
        t2d = t_flat.reshape(rows_all, LANES)
    else:
        s2d = s_flat[: rows_all * LANES].reshape(rows_all, LANES)
        t2d = t_flat[: rows_all * LANES].reshape(rows_all, LANES)

    # 2 reduction partitions whenever there are >= 2 blocks: the leading "parallel"
    # axis lets the two v7x TensorCores each own ~half the rows (near-free serial
    # loop on 1-TC v5e/v6e).  Odd block counts stay 2-way via the gated phantom step.
    num_parts = 2 if blocks >= 2 else 1
    bpp = -(-blocks // num_parts)               # ceil-div
    gated = (num_parts * bpp) != blocks

    n_ch = tr // ch
    unroll = 1
    for u in (8, 4, 2):
        if n_ch % u == 0:
            unroll = u
            break

    if gated:
        in_map = lambda p, k: (jnp.minimum(p * bpp + k, blocks - 1), 0)
    else:
        in_map = lambda p, k: (p * bpp + k, 0)

    kernel = functools.partial(_ssd_kernel, ch=ch, n_ch=n_ch, bpp=bpp,
                               blocks=blocks, gated=gated, cast=cast, unroll=unroll)

    # Explicit VMEM budget: 2 inputs x 2 pipeline buffers x (tr,128) blocks + output
    # tiles + headroom for Mosaic temporaries.  Clamped to stay v7x-safe (64 MiB
    # physical) while exceeding v5e's 16 MiB scoped default.
    vmem_limit = 2 * 2 * tr * LANES * itemsize
    vmem_limit += 4 * num_parts * ch * LANES * 4
    vmem_limit += 8 << 20
    vmem_limit = int(min(max(vmem_limit, 16 << 20), 48 << 20))

    in_bytes = 2 * main_elems * itemsize
    out_bytes = num_parts * ch * LANES * 4

    partials = pl.pallas_call(
        kernel,
        out_shape=jax.ShapeDtypeStruct((num_parts * ch, LANES), jnp.float32),
        grid_spec=pltpu.PrefetchScalarGridSpec(
            num_scalar_prefetch=0,
            grid=(num_parts, bpp),
            in_specs=[
                pl.BlockSpec((tr, LANES), in_map),
                pl.BlockSpec((tr, LANES), in_map),
            ],
            # One (ch,128) partial-sum tile per partition; resident in VMEM across
            # the reduction axis (block index constant in k), written back once.
            out_specs=pl.BlockSpec((ch, LANES), lambda p, k: (p, 0)),
        ),
        compiler_params=pltpu.CompilerParams(
            dimension_semantics=("parallel", "arbitrary"),
            vmem_limit_bytes=vmem_limit,
        ),
        cost_estimate=pl.CostEstimate(
            flops=3 * main_elems,
            transcendentals=0,
            bytes_accessed=in_bytes + out_bytes,
        ),
    )(s2d, t2d)

    total = jnp.sum(partials)

    # Tiny unaligned tail (< tr*128 + 128 elements): summed by plain XLA in the
    # wrapper instead of padded/masked edge blocks inside the kernel.
    rem = n - main_elems
    if rem:
        rs = s_flat[main_elems:].astype(jnp.float32)
        rt = t_flat[main_elems:].astype(jnp.float32)
        rd = rs - rt
        total = total + jnp.sum(rd * rd)

    return total / n


if __name__ == "__main__":
    key = jax.random.PRNGKey(0)
    k1, k2 = jax.random.split(key)

    # Small NCHW feature maps (student / teacher) consistent with HintLoss usage.
    fm_s = jax.random.normal(k1, (2, 4, 16, 16), dtype=jnp.float32)
    fm_t = jax.random.normal(k2, (2, 4, 16, 16), dtype=jnp.float32)
    loss = hint_loss(fm_s, fm_t)
    jax.block_until_ready(loss)
    ref = jnp.mean((fm_s - fm_t) ** 2)
    assert jnp.allclose(loss, ref, rtol=1e-5, atol=1e-6), (loss, ref)

    # Coverage: odd block count (2-way gated split) + unaligned tail in wrapper.
    k3, k4 = jax.random.split(k2)
    a = jax.random.normal(k3, (5298,), dtype=jnp.float32)   # 41 rows + 50-elem tail
    b = jax.random.normal(k4, (5298,), dtype=jnp.float32)
    out2 = hint_loss(a, b, tile_rows=8)                     # 5 blocks -> gated 2-way
    jax.block_until_ready(out2)
    assert jnp.allclose(out2, jnp.mean((a - b) ** 2), rtol=1e-5, atol=1e-5)

    # Coverage: multi-chunk fori_loop accumulator + even 2-way split.
    k5, k6 = jax.random.split(k4)
    c = jax.random.normal(k5, (4, 16, 64, 64), dtype=jnp.float32)  # 262144 elems
    d = jax.random.normal(k6, (4, 16, 64, 64), dtype=jnp.float32)
    out3 = hint_loss(c, d, tile_rows=512)                   # 4 blocks, 8 chunks/block
    jax.block_until_ready(out3)
    assert jnp.allclose(out3, jnp.mean((c - d) ** 2), rtol=1e-5, atol=1e-5)

    # Coverage: bf16 inputs (dtype-scaled tiles, in-kernel f32 upcast).
    k7, k8 = jax.random.split(k6)
    e = jax.random.normal(k7, (2, 8, 32, 32), dtype=jnp.bfloat16)
    f = jax.random.normal(k8, (2, 8, 32, 32), dtype=jnp.bfloat16)
    out4 = hint_loss(e, f)
    jax.block_until_ready(out4)
    ref4 = jnp.mean((e.astype(jnp.float32) - f.astype(jnp.float32)) ** 2)
    assert jnp.allclose(out4, ref4, rtol=1e-5, atol=1e-5)

    print("KERNEL_OK")
</pallas_src>

<mosaic_0001>
module attributes {stable_mosaic.version = 11 : i64} {
  func.func @_ssd_kernel(%arg0: i32, %arg1: i32, %arg2: memref<16x128xf32, #tpu.memory_space<vmem>>, %arg3: memref<16x128xf32, #tpu.memory_space<vmem>>, %arg4: memref<16x128xf32, #tpu.memory_space<vmem>>) attributes {dimension_semantics = [#tpu.dimension_semantics<parallel>, #tpu.dimension_semantics<arbitrary>], iteration_bounds = array<i64: 1, 1>, scalar_prefetch = 0 : i64, scratch_operands = 0 : i64, tpu.core_type = #tpu.core_type<tc>, window_params = [{transform_indices = @transform_0, window_bounds = array<i64: 16, 128>}, {transform_indices = @transform_1, window_bounds = array<i64: 16, 128>}, {transform_indices = @transform_2, window_bounds = array<i64: 16, 128>}]} {
    %c0_i32 = arith.constant 0 : i32
    %0 = arith.cmpi eq, %arg1, %c0_i32 : i32
    %1 = arith.extui %0 : i1 to i32
    %c0_i32_0 = arith.constant 0 : i32
    %2 = arith.cmpi ne, %1, %c0_i32_0 : i32
    scf.if %2 {
      %cst_7 = arith.constant 0.000000e+00 : f32
      %16 = vector.broadcast %cst_7 : f32 to vector<16x128xf32>
      %c0_8 = arith.constant 0 : index
      %c0_9 = arith.constant 0 : index
      %17 = vector.load %arg4[%c0_8, %c0_9] : memref<16x128xf32, #tpu.memory_space<vmem>>, vector<16x128xf32>
      tpu.vector_store %arg4[%c0_8, %c0_9], %16 {strides = array<i32>} : memref<16x128xf32, #tpu.memory_space<vmem>>, vector<16x128xf32>,
    } else {
    }
    %cst = arith.constant 0.000000e+00 : f32
    %3 = vector.broadcast %cst : f32 to vector<16x128xf32>
    %c0_i32_1 = arith.constant 0 : i32
    %c16_i32 = arith.constant 16 : i32
    %4 = arith.muli %c0_i32_1, %c16_i32 : i32
    %5 = tpu.assume_multiple %4, 16 : i32
    %6 = arith.index_cast %5 : i32 to index
    %c0 = arith.constant 0 : index
    %7 = vector.load %arg2[%6, %c0] : memref<16x128xf32, #tpu.memory_space<vmem>>, vector<16x128xf32>
    %8 = arith.index_cast %5 : i32 to index
    %c0_2 = arith.constant 0 : index
    %9 = vector.load %arg3[%8, %c0_2] : memref<16x128xf32, #tpu.memory_space<vmem>>, vector<16x128xf32>
    %10 = arith.subf %7, %9 : vector<16x128xf32>
    %11 = arith.mulf %10, %10 : vector<16x128xf32>
    %12 = arith.addf %3, %11 : vector<16x128xf32>
    %c1_i32 = arith.constant 1 : i32
    %c0_3 = arith.constant 0 : index
    %c0_4 = arith.constant 0 : index
    %13 = vector.load %arg4[%c0_3, %c0_4] : memref<16x128xf32, #tpu.memory_space<vmem>>, vector<16x128xf32>
    %14 = arith.addf %13, %12 : vector<16x128xf32>
    %c0_5 = arith.constant 0 : index
    %c0_6 = arith.constant 0 : index
    %15 = vector.load %arg4[%c0_5, %c0_6] : memref<16x128xf32, #tpu.memory_space<vmem>>, vector<16x128xf32>
    tpu.vector_store %arg4[%c0_5, %c0_6], %14 {strides = array<i32>} : memref<16x128xf32, #tpu.memory_space<vmem>>, vector<16x128xf32>,
    return
  }
  func.func @transform_0(%arg0: i32, %arg1: i32) -> (i32, i32) {
    %c1_i32 = arith.constant 1 : i32
    %0 = arith.muli %arg0, %c1_i32 : i32
    %1 = arith.addi %0, %arg1 : i32
    %c0_i32 = arith.constant 0 : i32
    %c0_i32_0 = arith.constant 0 : i32
    return %1, %c0_i32 : i32, i32
  }
  func.func @transform_1(%arg0: i32, %arg1: i32) -> (i32, i32) {
    %c1_i32 = arith.constant 1 : i32
    %0 = arith.muli %arg0, %c1_i32 : i32
    %1 = arith.addi %0, %arg1 : i32
    %c0_i32 = arith.constant 0 : i32
    %c0_i32_0 = arith.constant 0 : i32
    return %1, %c0_i32 : i32, i32
  }
  func.func @transform_2(%arg0: i32, %arg1: i32) -> (i32, i32) {
    %c0_i32 = arith.constant 0 : i32
    %c0_i32_0 = arith.constant 0 : i32
    return %arg0, %c0_i32 : i32, i32
  }
}

</mosaic_0001>

<bundles_post_ra>
// kernel: tpu_custom_call.1
= control target key start
LH: loop header
LB: loop body
LE: loop exit
PB: predicated region body
PF: predicated region fallthrough
CT: control target
= control target key end

     0   :  { %7 = vsyncpa [#allocation3], 0  ;;  %s220_s0 = inlined_call_operand.hbm [shape: f32[16,128], index: 0, kind: input, shape index: {}]   ;;  %s221_s1 = inlined_call_operand.hbm [shape: f32[16,128], index: 1, kind: input, shape index: {}]   ;;  %s222_s2 = inlined_call_operand.hbm [shape: f32[16,128], index: 2, kind: output, shape index: {}]  }
   0x1   :  { %8 = vsyncpa [#allocation6], 0 }
   0x2   :  { %9 = vsyncpa [#allocation4], 0  ;;  %s18_s11 = sshll.u32 %s220_s0, 4  ;;  %s182_s12 = smov [#allocation2]   ;;  %s19_s11 = int_to_ptr.hbm [resolvable:$true] %s18_s11 }
   0x3   :  { %s20_s13 = sshll.u32 %s182_s12, 4  ;;  %s35_s16 = sshll.u32 %s221_s1, 4  ;;  %s21_s13 = int_to_ptr.vmem [resolvable:$true] %s20_s13  ;;  %s36_s16 = int_to_ptr.hbm [resolvable:$true] %s35_s16 }
   0x4   :  { %s183_s17 = smov 128   ;;  %s184_s18 = smov 8  }
   0x5   :  { %26 = dma.hbm_to_vmem [thread:$0]  %s19_s11, 256, %s21_s13, [#allocation3], %s183_s17, %s183_s17, %s184_s18  }
   0x6   :  { %s185_s19 = smov [#allocation5]  }
   0x7   :  { %s37_s20 = sshll.u32 %s185_s19, 4  ;;  %s38_s20 = int_to_ptr.vmem [resolvable:$true] %s37_s20 }
   0x8   :  { %43 = dma.hbm_to_vmem [thread:$0]  %s36_s16, 256, %s38_s20, [#allocation6], %s183_s17, %s183_s17, %s184_s18  }
   0x9   :  { %176 = dma.done.wait [#allocation3], 256  }
   0xa   :  { %177 = vsyncadd [#allocation3], 4294967040 }
   0xb   :  { %178 = dma.done.wait [#allocation6], 256  }
   0xc   :  { %179 = vsyncadd [#allocation6], 4294967040  ;;  %v62_v0 = vld [vmem:[#allocation2] sm:$0xff]  ;;  %v64_v1 = vld [vmem:[#allocation5] sm:$0xff]  ;;  %s186_s0 = smov [#allocation7]   ;;  %s84_s23 = sshll.u32 %s222_s2, 4  ;;  %s85_s23 = int_to_ptr.hbm [resolvable:$true] %s84_s23 }
   0xd   :  { %v63_v2 = vld [vmem:[#allocation2 + $0x8] sm:$0xff]  ;;  %v66_v3 = vsub.f32 %v62_v0, %v64_v1  ;;  %v65_v4 = vld [vmem:[#allocation5 + $0x8] sm:$0xff]  ;;  %s82_s1 = sshll.u32 %s186_s0, 4  ;;  %s83_s1 = int_to_ptr.vmem [resolvable:$true] %s82_s1 }
   0xe   :  { %v67_v5 = vsub.f32 %v63_v2, %v65_v4 }
   0xf   :  { %v68_v6 = vmul.f32 %v66_v3, %v66_v3 }
  0x10   :  { %v69_v7 = vmul.f32 %v67_v5, %v67_v5 }
  0x11   :  { %76 = vst [vmem:[#allocation7] sm:$0xff] %v68_v6 }
  0x12   :  { %77 = vst [vmem:[#allocation7 + $0x8] sm:$0xff] %v69_v7 }
  0x13   :  { %90 = dma.vmem_to_hbm [thread:$0]  %s83_s1, 256, %s85_s23, [#allocation4], %s183_s17, %s183_s17, %s184_s18  }
  0x14   :  { %180 = dma.done.wait [#allocation4], 256  }
  0x15   :  { %181 = vsyncadd [#allocation4], 4294967040 }
  0x16   :  { %95 = vsyncpa [#allocation3], 1 }
  0x17   :  { %96 = vsyncpa [#allocation6], 1 }
  0x18   :  { %97 = vsyncpa [#allocation4], 1 }

</bundles_post_ra>
